<compile_context>
chip_gen: v7x
topology: tpu7x:2x2x1
jax: 0.10.0
libtpu: 0.0.40
codegen_flags: <defaults>
</compile_context>

<pallas_src>
import math

import jax
import jax.numpy as jnp
from jax.experimental import pallas as pl
from jax.experimental.pallas import tpu as pltpu


def critic_kernel(s_ref, a_ref, w1s_ref, w1a_ref, b1_ref,
                  w2_ref, b2_ref, w3_ref, b3_ref, o_ref):
    """Fused 3-layer MLP forward (2x LeakyReLU(0.01), final linear as VPU reduce)."""
    # Layer 1: fused concat -> split-weight matmuls (MXU), f32 accumulate.
    h1 = (jnp.dot(s_ref[...], w1s_ref[...], preferred_element_type=jnp.float32)
          + jnp.dot(a_ref[...], w1a_ref[...], preferred_element_type=jnp.float32)
          + b1_ref[...])
    h1 = jnp.where(h1 > 0, h1, 0.01 * h1)            # LeakyReLU(0.01)

    # Layer 2 (MXU).
    h2 = jnp.dot(h1, w2_ref[...], preferred_element_type=jnp.float32) + b2_ref[...]
    h2 = jnp.where(h2 > 0, h2, 0.01 * h2)            # LeakyReLU(0.01)

    # Layer 3: N=1 output -> VPU multiply + lane reduce instead of an MXU matmul.
    out = jnp.sum(h2 * w3_ref[...], axis=-1, keepdims=True) + b3_ref[...]
    o_ref[...] = out.astype(o_ref.dtype)


def critic_forward(state, action, params, *, tb=512):
    """JAX wrapper: batch-gridded fused Pallas MLP kernel (no host-side concat)."""
    w1s, w1a, b1, w2, b2, w3_row, b3 = params
    B, S = state.shape
    _, A = action.shape
    H1 = w1s.shape[1]
    H2 = w2.shape[1]

    TB = min(tb, B)                                   # row tile (full batch if small)
    grid = (pl.cdiv(B, TB),)

    batched = lambda shape: pl.BlockSpec(shape, lambda i: (i, 0))   # moves with grid
    resident = lambda shape: pl.BlockSpec(shape, lambda i: (0, 0))  # VMEM-resident

    return pl.pallas_call(
        critic_kernel,
        out_shape=jax.ShapeDtypeStruct((B, 1), jnp.float32),
        grid=grid,
        in_specs=[
            batched((TB, S)),        # state
            batched((TB, A)),        # action
            resident((S, H1)),       # W1_s
            resident((A, H1)),       # W1_a
            resident((1, H1)),       # b1
            resident((H1, H2)),      # W2
            resident((1, H2)),       # b2
            resident((1, H2)),       # W3 (row)
            resident((1, 1)),        # b3
        ],
        out_specs=batched((TB, 1)),
        compiler_params=pltpu.CompilerParams(
            dimension_semantics=("parallel",)),       # 2 TCs on v7x; no-op elsewhere
    )(state, action, w1s, w1a, b1, w2, b2, w3_row, b3)


def init_critic_params(key, state_dim, action_dim, num_units_1, num_units_2):
    """PyTorch-style init: Linear default uniform(+-1/sqrt(fan_in)), all three
    weights scaled by gain = calculate_gain('leaky_relu') = sqrt(2/(1+0.01^2)).
    W1 is returned pre-split into (state rows, action rows)."""
    gain = math.sqrt(2.0 / (1.0 + 0.01 ** 2))
    dims = [(state_dim + action_dim, num_units_1),
            (num_units_1, num_units_2),
            (num_units_2, 1)]
    raw = []
    for (fan_in, fan_out) in dims:
        key, kw, kb = jax.random.split(key, 3)
        bound = 1.0 / math.sqrt(fan_in)
        w = jax.random.uniform(kw, (fan_in, fan_out), jnp.float32, -bound, bound) * gain
        b = jax.random.uniform(kb, (1, fan_out), jnp.float32, -bound, bound)
        raw += [w, b]
    w1, b1, w2, b2, w3, b3 = raw
    w1s, w1a = w1[:state_dim], w1[state_dim:]         # split for fused concat
    w3_row = w3.T                                     # (1, H2) row for VPU reduce
    return (w1s, w1a, b1, w2, b2, w3_row, b3)


def critic_reference(state, action, params):
    """Pure-JAX reference for correctness checking."""
    w1s, w1a, b1, w2, b2, w3_row, b3 = params
    x = jnp.concatenate([state, action], axis=1)
    w1 = jnp.concatenate([w1s, w1a], axis=0)
    lrelu = lambda v: jnp.where(v > 0, v, 0.01 * v)
    h = lrelu(x @ w1 + b1)
    h = lrelu(h @ w2 + b2)
    return h @ w3_row.T + b3


if __name__ == "__main__":
    # Small shapes consistent with the module's forward.
    batch = 8
    state_dim = 12
    action_dim = 4
    num_units_1 = 64
    num_units_2 = 64

    key = jax.random.PRNGKey(0)
    k_state, k_action, k_params = jax.random.split(key, 3)

    state = jax.random.normal(k_state, (batch, state_dim), jnp.float32)
    action = jax.random.normal(k_action, (batch, action_dim), jnp.float32)
    params = init_critic_params(k_params, state_dim, action_dim,
                                num_units_1, num_units_2)

    out = critic_forward(state, action, params)
    out = jax.block_until_ready(out)

    ref = critic_reference(state, action, params)
    assert out.shape == (batch, 1), out.shape
    assert jnp.allclose(out, ref, atol=1e-5, rtol=1e-5), "mismatch vs reference"

    print("KERNEL_OK")
</pallas_src>

<mosaic_0001>
module attributes {stable_mosaic.version = 11 : i64} {
  func.func @critic_kernel(%arg0: i32, %arg1: memref<8x12xf32, #tpu.memory_space<vmem>>, %arg2: memref<8x4xf32, #tpu.memory_space<vmem>>, %arg3: memref<12x64xf32, #tpu.memory_space<vmem>>, %arg4: memref<4x64xf32, #tpu.memory_space<vmem>>, %arg5: memref<1x64xf32, #tpu.memory_space<vmem>>, %arg6: memref<64x64xf32, #tpu.memory_space<vmem>>, %arg7: memref<1x64xf32, #tpu.memory_space<vmem>>, %arg8: memref<1x64xf32, #tpu.memory_space<vmem>>, %arg9: memref<1x1xf32, #tpu.memory_space<vmem>>, %arg10: memref<8x1xf32, #tpu.memory_space<vmem>>) attributes {dimension_semantics = [#tpu.dimension_semantics<parallel>], iteration_bounds = array<i64: 1>, scalar_prefetch = 0 : i64, scratch_operands = 0 : i64, tpu.core_type = #tpu.core_type<tc>, window_params = [{transform_indices = @transform_0, window_bounds = array<i64: 8, 12>}, {transform_indices = @transform_1, window_bounds = array<i64: 8, 4>}, {pipeline_mode = #tpu.pipeline_mode<synchronous>, transform_indices = @transform_2, window_bounds = array<i64: 12, 64>}, {pipeline_mode = #tpu.pipeline_mode<synchronous>, transform_indices = @transform_3, window_bounds = array<i64: 4, 64>}, {pipeline_mode = #tpu.pipeline_mode<synchronous>, transform_indices = @transform_4, window_bounds = array<i64: 1, 64>}, {pipeline_mode = #tpu.pipeline_mode<synchronous>, transform_indices = @transform_5, window_bounds = array<i64: 64, 64>}, {pipeline_mode = #tpu.pipeline_mode<synchronous>, transform_indices = @transform_6, window_bounds = array<i64: 1, 64>}, {pipeline_mode = #tpu.pipeline_mode<synchronous>, transform_indices = @transform_7, window_bounds = array<i64: 1, 64>}, {pipeline_mode = #tpu.pipeline_mode<synchronous>, transform_indices = @transform_8, window_bounds = array<i64: 1, 1>}, {transform_indices = @transform_9, window_bounds = array<i64: 8, 1>}]} {
    %c0 = arith.constant 0 : index
    %c0_0 = arith.constant 0 : index
    %0 = vector.load %arg1[%c0, %c0_0] : memref<8x12xf32, #tpu.memory_space<vmem>>, vector<8x12xf32>
    %c0_1 = arith.constant 0 : index
    %c0_2 = arith.constant 0 : index
    %1 = vector.load %arg3[%c0_1, %c0_2] : memref<12x64xf32, #tpu.memory_space<vmem>>, vector<12x64xf32>
    %cst = arith.constant dense<0.000000e+00> : vector<8x64xf32>
    %2 = tpu.matmul %0, %1, %cst {dimension_numbers = #tpu.dot_dimension_numbers<[1], [0], [0], [1], [0, 0, 1, 1], [], []>} : vector<8x12xf32>, vector<12x64xf32>, vector<8x64xf32> -> vector<8x64xf32>
    %c0_3 = arith.constant 0 : index
    %c0_4 = arith.constant 0 : index
    %3 = vector.load %arg2[%c0_3, %c0_4] : memref<8x4xf32, #tpu.memory_space<vmem>>, vector<8x4xf32>
    %c0_5 = arith.constant 0 : index
    %c0_6 = arith.constant 0 : index
    %4 = vector.load %arg4[%c0_5, %c0_6] : memref<4x64xf32, #tpu.memory_space<vmem>>, vector<4x64xf32>
    %cst_7 = arith.constant dense<0.000000e+00> : vector<8x64xf32>
    %5 = tpu.matmul %3, %4, %cst_7 {dimension_numbers = #tpu.dot_dimension_numbers<[1], [0], [0], [1], [0, 0, 1, 1], [], []>} : vector<8x4xf32>, vector<4x64xf32>, vector<8x64xf32> -> vector<8x64xf32>
    %6 = arith.addf %2, %5 : vector<8x64xf32>
    %c0_8 = arith.constant 0 : index
    %c0_9 = arith.constant 0 : index
    %7 = vector.load %arg5[%c0_8, %c0_9] : memref<1x64xf32, #tpu.memory_space<vmem>>, vector<1x64xf32>
    %8 = vector.broadcast %7 : vector<1x64xf32> to vector<8x64xf32>
    %9 = arith.addf %6, %8 : vector<8x64xf32>
    %cst_10 = arith.constant 0.000000e+00 : f32
    %10 = vector.broadcast %cst_10 : f32 to vector<8x64xf32>
    %11 = arith.cmpf ogt, %9, %10 : vector<8x64xf32>
    %cst_11 = arith.constant 0.00999999977 : f32
    %12 = vector.broadcast %cst_11 : f32 to vector<8x64xf32>
    %13 = arith.mulf %12, %9 : vector<8x64xf32>
    %14 = arith.select %11, %9, %13 : vector<8x64xi1>, vector<8x64xf32>
    %c0_12 = arith.constant 0 : index
    %c0_13 = arith.constant 0 : index
    %15 = vector.load %arg6[%c0_12, %c0_13] : memref<64x64xf32, #tpu.memory_space<vmem>>, vector<64x64xf32>
    %cst_14 = arith.constant dense<0.000000e+00> : vector<8x64xf32>
    %16 = tpu.matmul %14, %15, %cst_14 {dimension_numbers = #tpu.dot_dimension_numbers<[1], [0], [0], [1], [0, 0, 1, 1], [], []>} : vector<8x64xf32>, vector<64x64xf32>, vector<8x64xf32> -> vector<8x64xf32>
    %c0_15 = arith.constant 0 : index
    %c0_16 = arith.constant 0 : index
    %17 = vector.load %arg7[%c0_15, %c0_16] : memref<1x64xf32, #tpu.memory_space<vmem>>, vector<1x64xf32>
    %18 = vector.broadcast %17 : vector<1x64xf32> to vector<8x64xf32>
    %19 = arith.addf %16, %18 : vector<8x64xf32>
    %cst_17 = arith.constant 0.000000e+00 : f32
    %20 = vector.broadcast %cst_17 : f32 to vector<8x64xf32>
    %21 = arith.cmpf ogt, %19, %20 : vector<8x64xf32>
    %cst_18 = arith.constant 0.00999999977 : f32
    %22 = vector.broadcast %cst_18 : f32 to vector<8x64xf32>
    %23 = arith.mulf %22, %19 : vector<8x64xf32>
    %24 = arith.select %21, %19, %23 : vector<8x64xi1>, vector<8x64xf32>
    %c0_19 = arith.constant 0 : index
    %c0_20 = arith.constant 0 : index
    %25 = vector.load %arg8[%c0_19, %c0_20] : memref<1x64xf32, #tpu.memory_space<vmem>>, vector<1x64xf32>
    %26 = vector.broadcast %25 : vector<1x64xf32> to vector<8x64xf32>
    %27 = arith.mulf %24, %26 : vector<8x64xf32>
    %cst_21 = arith.constant dense<0.000000e+00> : vector<8xf32>
    %28 = vector.multi_reduction <add>, %27, %cst_21 [1] : vector<8x64xf32> to vector<8xf32>
    %29 = vector.shape_cast %28 : vector<8xf32> to vector<8x1xf32>
    %c0_22 = arith.constant 0 : index
    %c0_23 = arith.constant 0 : index
    %30 = vector.load %arg9[%c0_22, %c0_23] : memref<1x1xf32, #tpu.memory_space<vmem>>, vector<1x1xf32>
    %31 = vector.broadcast %30 : vector<1x1xf32> to vector<8x1xf32>
    %32 = arith.addf %29, %31 : vector<8x1xf32>
    %c0_24 = arith.constant 0 : index
    %c0_25 = arith.constant 0 : index
    %33 = vector.load %arg10[%c0_24, %c0_25] : memref<8x1xf32, #tpu.memory_space<vmem>>, vector<8x1xf32>
    tpu.vector_store %arg10[%c0_24, %c0_25], %32 {strides = array<i32>} : memref<8x1xf32, #tpu.memory_space<vmem>>, vector<8x1xf32>,
    return
  }
  func.func @transform_0(%arg0: i32) -> (i32, i32) {
    %c0_i32 = arith.constant 0 : i32
    %c0_i32_0 = arith.constant 0 : i32
    return %arg0, %c0_i32 : i32, i32
  }
  func.func @transform_1(%arg0: i32) -> (i32, i32) {
    %c0_i32 = arith.constant 0 : i32
    %c0_i32_0 = arith.constant 0 : i32
    return %arg0, %c0_i32 : i32, i32
  }
  func.func @transform_2(%arg0: i32) -> (i32, i32) {
    %c0_i32 = arith.constant 0 : i32
    %c0_i32_0 = arith.constant 0 : i32
    %c0_i32_1 = arith.constant 0 : i32
    return %c0_i32, %c0_i32_0 : i32, i32
  }
  func.func @transform_3(%arg0: i32) -> (i32, i32) {
    %c0_i32 = arith.constant 0 : i32
    %c0_i32_0 = arith.constant 0 : i32
    %c0_i32_1 = arith.constant 0 : i32
    return %c0_i32, %c0_i32_0 : i32, i32
  }
  func.func @transform_4(%arg0: i32) -> (i32, i32) {
    %c0_i32 = arith.constant 0 : i32
    %c0_i32_0 = arith.constant 0 : i32
    %c0_i32_1 = arith.constant 0 : i32
    return %c0_i32, %c0_i32_0 : i32, i32
  }
  func.func @transform_5(%arg0: i32) -> (i32, i32) {
    %c0_i32 = arith.constant 0 : i32
    %c0_i32_0 = arith.constant 0 : i32
    %c0_i32_1 = arith.constant 0 : i32
    return %c0_i32, %c0_i32_0 : i32, i32
  }
  func.func @transform_6(%arg0: i32) -> (i32, i32) {
    %c0_i32 = arith.constant 0 : i32
    %c0_i32_0 = arith.constant 0 : i32
    %c0_i32_1 = arith.constant 0 : i32
    return %c0_i32, %c0_i32_0 : i32, i32
  }
  func.func @transform_7(%arg0: i32) -> (i32, i32) {
    %c0_i32 = arith.constant 0 : i32
    %c0_i32_0 = arith.constant 0 : i32
    %c0_i32_1 = arith.constant 0 : i32
    return %c0_i32, %c0_i32_0 : i32, i32
  }
  func.func @transform_8(%arg0: i32) -> (i32, i32) {
    %c0_i32 = arith.constant 0 : i32
    %c0_i32_0 = arith.constant 0 : i32
    %c0_i32_1 = arith.constant 0 : i32
    return %c0_i32, %c0_i32_0 : i32, i32
  }
  func.func @transform_9(%arg0: i32) -> (i32, i32) {
    %c0_i32 = arith.constant 0 : i32
    %c0_i32_0 = arith.constant 0 : i32
    return %arg0, %c0_i32 : i32, i32
  }
}

</mosaic_0001>

<bundles_post_ra>
// kernel: tpu_custom_call.1
= control target key start
LH: loop header
LB: loop body
LE: loop exit
PB: predicated region body
PF: predicated region fallthrough
CT: control target
= control target key end

     0   :  { %s595_s0 = inlined_call_operand.hbm [shape: f32[8,12], index: 0, kind: input, shape index: {}]   ;;  %s596_s1 = inlined_call_operand.vmem [shape: f32[8,4], index: 1, kind: input, shape index: {}]   ;;  %s597_s2 = inlined_call_operand.vmem [shape: f32[12,64], index: 2, kind: input, shape index: {}]   ;;  %s598_s3 = inlined_call_operand.vmem [shape: f32[4,64], index: 3, kind: input, shape index: {}]   ;;  %s599_s4 = inlined_call_operand.vmem [shape: f32[1,64], index: 4, kind: input, shape index: {}]   ;;  %s600_s5 = inlined_call_operand.hbm [shape: f32[64,64], index: 5, kind: input, shape index: {}]   ;;  %s601_s6 = inlined_call_operand.vmem [shape: f32[1,64], index: 6, kind: input, shape index: {}]   ;;  %s602_s7 = inlined_call_operand.vmem [shape: f32[1,64], index: 7, kind: input, shape index: {}]   ;;  %s603_s8 = inlined_call_operand.<no memory space> [shape: f32[1,1], index: 8, kind: input, shape index: {}]   ;;  %s604_s9 = inlined_call_operand.vmem [shape: f32[8,1], index: 9, kind: output, shape index: {}]  }
   0x1   :  { %v14_v0 = vstv %s603_s8 }
   0x2   :  { %15 = vst [vmem:[#allocation2] sm:$0x1] %v14_v0 }
   0x3   :  { %16 = vsyncpa [#allocation4], 0 }
   0x4   :  { %17 = vsyncpa [#allocation6], 0  ;;  %s476_s11 = smov [#allocation3]   ;;  %s477_s13 = smov [#allocation5]  }
   0x5   :  { %s24_s12 = sshll.u32 %s476_s11, 4  ;;  %s41_s14 = sshll.u32 %s477_s13, 4  ;;  %s25_s12 = int_to_ptr.vmem [resolvable:$true] %s24_s12  ;;  %s537_s14 = int_to_ptr.vmem [resolvable:$true] %s41_s14 }
   0x6   :  { %s428_s17 = scalar_lea.hbm %s595_s0, 128 }
   0x7   :  { %p429_p0 = scmp.ne.s32.totalorder %s595_s0, %s428_s17  ;;  %p432_p1 = scmp.lt.u32.totalorder %s428_s17, %s595_s0 }
   0x9   :  { %p434_p2 = pnand %p432_p1, %p429_p0 }
   0xb   :  { %437 = shalt.err (!%p434_p2)
}
   0xc   :  { %s438_s21 = scalar_lea.vmem %s25_s12, 128  ;;  %p443_p4 = scmp.lt.s32.totalorder %s25_s12, %s25_s12 }
   0xd   :  { %p439_p3 = scmp.ne.s32.totalorder %s25_s12, %s438_s21  ;;  %p444_p5 = scmp.lt.s32.totalorder %s438_s21, %s438_s21 }
   0xf   :  { %p445_p6 = por %p444_p5, %p443_p4 }
  0x11   :  { %p446_p7 = pnand %p445_p6, %p439_p3 }
  0x13   :  { %449 = shalt.err (!%p446_p7)
}
  0x14   :  { %27 = dma.hbm_to_vmem [thread:$0]  %s595_s0, 128, %s25_s12, [#allocation4]  }
  0x15   :  { %s450_s26 = scalar_lea.hbm %s600_s5, 1024 }
  0x16   :  { %p451_p8 = scmp.ne.s32.totalorder %s600_s5, %s450_s26  ;;  %p454_p9 = scmp.lt.u32.totalorder %s450_s26, %s600_s5 }
  0x18   :  { %p456_p10 = pnand %p454_p9, %p451_p8 }
  0x1a   :  { %459 = shalt.err (!%p456_p10)
}
  0x1b   :  { %s460_s10 = scalar_lea.vmem %s537_s14, 1024  ;;  %p465_p12 = scmp.lt.s32.totalorder %s537_s14, %s537_s14 }
  0x1c   :  { %p461_p11 = scmp.ne.s32.totalorder %s537_s14, %s460_s10  ;;  %p466_p13 = scmp.lt.s32.totalorder %s460_s10, %s460_s10 }
  0x1e   :  { %p467_p0 = por %p466_p13, %p465_p12 }
  0x20   :  { %p468_p1 = pnand %p467_p0, %p461_p11 }
  0x22   :  { %471 = shalt.err (!%p468_p1)
}
  0x23   :  { %s478_s0 = smov 128   ;;  %s479_s11 = smov 8  }
  0x24   :  { %47 = dma.hbm_to_vmem [thread:$0]  %s600_s5, 1024, %s537_s14, [#allocation6], %s478_s0, %s478_s0, %s479_s11  }
  0x25   :  { %472 = dma.done.wait [#allocation4], 128  }
  0x26   :  { %473 = vsyncadd [#allocation4], 4294967168 }
  0x27   :  { %474 = dma.done.wait [#allocation6], 1024  }
  0x28   :  { %475 = vsyncadd [#allocation6], 4294966272  ;;  %v480_v1 = vmov 0.0   ;;  %vm481_vm0 = vmmov 0   ;;  %v482_v2 = vmov 0.0|0.0   ;;  %vm69_vm1 = vcmask 1043456  }
  0x29   :  { %373 = vmatprep.subr.mxu1 %v480_v1  ;;  %375 = vmatprep.mubr.msk.f32.mxu1 %vm481_vm0, %v480_v1  ;;  %vm65_vm2 = vcmask 31744   ;;  %v64_v3 = vld [vmem:[%s598_s3] sm:$0xf]  ;;  %vm483_vm3 = vmmov 1   ;;  %v62_v6 = vld [vmem:[%s597_s2 + $0x8] sm:$0xf] }
  0x2a   :  { %408 = vmatprep.subr.bf16.mxu0 %v482_v2  ;;  %401 = vmatprep.mubr.msk.f32.mxu0 %vm481_vm0, %v480_v1  ;;  %v63_v4 = vld [vmem:[%s596_s1] sm:$0xff]  ;;  %vm406_vm4 = vmpackc.low %vm69_vm1, %vm483_vm3  ;;  %v231_v7 = vld [vmem:[#allocation5] sm:$0xff]  ;;  %vm143_vm5 = vcmask 97280   ;;  %vm246_vm7 = vcmask 523264   ;;  %vm342_vm9 = vcmask 7168  }
  0x2b   :  { %v61_v5 = vld [vmem:[%s597_s2] sm:$0xff]  ;;  %374 = vmatpush3.msk.msra.mxu1 %vm69_vm1, %v64_v3  ;;  %v232_v9 = vld [vmem:[#allocation5 + $0x8] sm:$0xff]  ;;  %v235_v15 = vld [vmem:[#allocation5 + $0x20] sm:$0xff] }
  0x2c   :  { %376 = vmatmul.mubr.msk.f32.vlgmr.msra.gmra.mrb[0].mxu1 %vm65_vm2, %v63_v4  ;;  %404 = vmatprep.subr.bf16.mxu1 %v482_v2  ;;  %v405_v8 = vpack.c.bf16 %v62_v6, %v61_v5  ;;  %v409_v10 = vpack.c.bf16 %v232_v9, %v231_v7  ;;  %v60_v11 = vld [vmem:[#allocation3] sm:$0xff]  ;;  %v233_v12 = vld [vmem:[#allocation5 + $0x10] sm:$0xff]  ;;  %v236_v16 = vld [vmem:[#allocation5 + $0x28] sm:$0xff] }
  0x2d   :  { %382 = vmatprep.mubr.msk.f32.mxu1 %vm481_vm0, %v480_v1  ;;  %v234_v13 = vld [vmem:[#allocation5 + $0x18] sm:$0xff]  ;;  %v415_v17 = vpack.c.bf16 %v236_v16, %v235_v15  ;;  %v237_v18 = vld [vmem:[#allocation5 + $0x30] sm:$0xff] }
  0x2e   :  { %407 = vmatpush3.bf16.msk.msra.mxu1 %vm406_vm4, %v405_v8  ;;  %410 = vmatpush3.bf16.msra.mxu0 %v409_v10  ;;  %v412_v14 = vpack.c.bf16 %v234_v13, %v233_v12  ;;  %v238_v19 = vld [vmem:[#allocation5 + $0x38] sm:$0xff]  ;;  %v354_v24 = vld [vmem:[%s599_s4] ss:$0 sm:$0xff] }
  0x2f   :  { %411 = vmatprep.subr.bf16.mxu0 %v482_v2  ;;  %v418_v20 = vpack.c.bf16 %v238_v19, %v237_v18  ;;  %v355_v30 = vld [vmem:[%s601_s6] ss:$0 sm:$0xff] }
  0x30   :  { %v357_v35 = vld [vmem:[%s602_s7] ss:$0 sm:$0xff] }
  0x31   :  { %383 = vmatmul.mubr.msk.f32.vlgmr.msra.gmra.mrb[2].mxu1 %vm143_vm5, %v60_v11  ;;  %v358_v39 = vld [vmem:[#allocation2] ss:$0 sm:$0xff] }
  0x32   :  { %413 = vmatpush3.bf16.msra.mxu0 %v412_v14 }
  0x33   :  { %414 = vmatprep.subr.bf16.mxu0 %v482_v2 }
  0x36   :  { %416 = vmatpush3.bf16.msra.mxu0 %v415_v17 }
  0x37   :  { %417 = vmatprep.subr.bf16.mxu0 %v482_v2 }
  0x3a   :  { %419 = vmatpush3.bf16.msra.mxu0 %v418_v20 }
  0xff   :  { %v139_v21 = vpop.f32.mrb[0].mxu1 }
 0x100   :  { %v377_v22 = vpop.f32.mrb[1].mxu1 }
 0x104   :  { %v216_v23 = vpop.f32.mrb[2].mxu1 }
 0x105   :  { %v217_v25 = vadd.f32 %v216_v23, %v139_v21  ;;  %v384_v26 = vpop.f32.mrb[3].mxu1 }
 0x107   :  { %v227_v27 = vadd.f32 %v354_v24, %v217_v25 }
 0x109   :  { %v229_v28 = vmul.f32 0.01, %v227_v27  ;;  %vm228_vm6 = vcmp.gt.f32.partialorder %v227_v27, 0.0 }
 0x10b   :  { %v230_v29 = vsel %vm228_vm6, %v227_v27, %v229_v28 }
 0x10c   :  { %402 = vmatmul.mubr.msk.f32.vlgmr.msra.gmra.mrb[0].mxu0 %vm246_vm7, %v230_v29 }
 0x1df   :  { %v316_v31 = vpop.f32.mrb[0].mxu0 }
 0x1e0   :  { %v317_v32 = vadd.f32 %v355_v30, %v316_v31  ;;  %v403_v33 = vpop.f32.mrb[1].mxu0 }
 0x1e2   :  { %v321_v34 = vmul.f32 0.01, %v317_v32  ;;  %vm320_vm8 = vcmp.gt.f32.partialorder %v317_v32, 0.0 }
 0x1e4   :  { %v322_v36 = vsel %vm320_vm8, %v317_v32, %v321_v34 }
 0x1e5   :  { %v330_v37 = vmul.f32 %v357_v35, %v322_v36 }
 0x1e7   :  { %v331_v38 = vsel %vm246_vm7, %v330_v37, 0.0 }
 0x1e8   :  { %332 = vadd.xlane.f32.xlu0 %v331_v38 }
 0x275   :  { %v333_v40 = vpop.xlane.xlu0 %332 }
 0x276   :  { %v341_v41 = vadd.f32 %v358_v39, %v333_v40 }
 0x278   :  { %343 = vst.msk [vmem:[%s604_s9] sm:$0xff] %vm342_vm9, %v341_v41 }
 0x279   :  { %348 = vsyncpa [#allocation4], 1 }
 0x27a   :  { %349 = vsyncpa [#allocation6], 1 }

</bundles_post_ra>
